<compile_context>
chip_gen: v7x
topology: tpu7x:2x2x1
jax: 0.10.0
libtpu: 0.0.40
codegen_flags: <defaults>
</compile_context>

<pallas_src>
import functools

import jax
import jax.numpy as jnp
import numpy as np
from jax import lax
from jax.experimental import pallas as pl
from jax.experimental.pallas import tpu as pltpu

EPS = 1e-5


def _stats_kernel(x_ref, w_ref, b_ref, scale_ref, shift_ref,
                  sum_vec, sq_vec, *, inv_n):
    """Pass 1: per-row sum / sum-of-squares -> per-row scale & shift."""
    ni = pl.program_id(1)

    @pl.when(ni == 0)
    def _():
        sum_vec[...] = jnp.zeros_like(sum_vec)
        sq_vec[...] = jnp.zeros_like(sq_vec)

    x = x_ref[...].astype(jnp.float32)
    sum_vec[...] += x           # VPU-only work on the per-chunk critical path
    sq_vec[...] += x * x

    @pl.when(ni == pl.num_programs(1) - 1)
    def _():
        # Single cross-lane (XLU) reduce per row block, at phase end.
        s = jnp.sum(sum_vec[...], axis=1, keepdims=True)       # (tb, 1)
        sq = jnp.sum(sq_vec[...], axis=1, keepdims=True)       # (tb, 1)
        mean = s * inv_n
        # E[x^2] - mean^2 in f32; clamp tiny negative from cancellation.
        var = jnp.maximum(sq * inv_n - mean * mean, 0.0)
        rstd = lax.rsqrt(var + EPS)                             # EUP slot
        w = w_ref[0, 0].astype(jnp.float32)                     # scalar (SMEM)
        b = b_ref[0, 0].astype(jnp.float32)
        scale = w * rstd
        scale_ref[...] = scale
        shift_ref[...] = b - mean * scale


def _norm_kernel(x_ref, scale_ref, shift_ref, o_ref):
    """Pass 2: out = x * scale + shift."""
    x = x_ref[...].astype(jnp.float32)
    o_ref[...] = (x * scale_ref[...] + shift_ref[...]).astype(o_ref.dtype)


def layer_normalizer(x, weight, bias, *, max_block_bytes=1 << 20):
    """LayerNormalizer.forward. x: (B,C,H,W); weight, bias: (1,1)."""
    B, C, H, W = x.shape
    N = C * H * W
    x2d = x.reshape(B, N)                 # free: NCHW is contiguous as (B, C*H*W)

    # --- tiling -----------------------------------------------------------
    tile_b = 8 if B % 8 == 0 else B       # sublane-dense batch tile when possible
    itemsize = x.dtype.itemsize
    if N % 128 == 0:
        max_chunk = max(128, (max_block_bytes // (tile_b * itemsize)) // 128 * 128)
        chunk = min(N, max_chunk)
        while N % chunk != 0:             # largest 128-multiple that divides N
            chunk -= 128
    else:
        chunk = N                         # full-width fallback (== array dim)
    nb, nn = B // tile_b, N // chunk

    # --- pass 1: per-row stats -> scale / shift ----------------------------
    scale, shift = pl.pallas_call(
        functools.partial(_stats_kernel, inv_n=1.0 / N),
        out_shape=(jax.ShapeDtypeStruct((B, 1), jnp.float32),
                   jax.ShapeDtypeStruct((B, 1), jnp.float32)),
        grid=(nb, nn),
        in_specs=[
            pl.BlockSpec((tile_b, chunk), lambda bi, ni: (bi, ni)),
            pl.BlockSpec(memory_space=pltpu.MemorySpace.SMEM),   # weight (1,1)
            pl.BlockSpec(memory_space=pltpu.MemorySpace.SMEM),   # bias   (1,1)
        ],
        out_specs=(
            pl.BlockSpec((tile_b, 1), lambda bi, ni: (bi, 0)),
            pl.BlockSpec((tile_b, 1), lambda bi, ni: (bi, 0)),
        ),
        scratch_shapes=[pltpu.VMEM((tile_b, chunk), jnp.float32),
                        pltpu.VMEM((tile_b, chunk), jnp.float32)],
        compiler_params=pltpu.CompilerParams(
            dimension_semantics=("parallel", "arbitrary")),
    )(x2d, weight, bias)

    # --- pass 2: normalize (fully parallel, pipelined) ---------------------
    out2d = pl.pallas_call(
        _norm_kernel,
        out_shape=jax.ShapeDtypeStruct((B, N), x.dtype),
        grid=(nb, nn),
        in_specs=[
            pl.BlockSpec((tile_b, chunk), lambda bi, ni: (bi, ni)),
            pl.BlockSpec((tile_b, 1), lambda bi, ni: (bi, 0)),   # resident across ni
            pl.BlockSpec((tile_b, 1), lambda bi, ni: (bi, 0)),
        ],
        out_specs=pl.BlockSpec((tile_b, chunk), lambda bi, ni: (bi, ni)),
        compiler_params=pltpu.CompilerParams(
            dimension_semantics=("parallel", "parallel")),
    )(x2d, scale, shift)

    return out2d.reshape(B, C, H, W)      # free reshape back to NCHW


def _reference(x, weight, bias):
    B, C, H, W = x.shape
    xf = x.reshape(B, -1).astype(jnp.float32)
    mean = xf.mean(axis=1, keepdims=True)
    var = ((xf - mean) ** 2).mean(axis=1, keepdims=True)   # biased (unbiased=False)
    xhat = (xf - mean) / jnp.sqrt(var + EPS)
    out = weight[0, 0] * xhat + bias[0, 0]
    return out.reshape(B, C, H, W).astype(x.dtype)


if __name__ == "__main__":
    key = jax.random.PRNGKey(0)
    B, C, H, W = 2, 4, 16, 16
    x = jax.random.normal(key, (B, C, H, W), dtype=jnp.float32)

    # LayerNormalizer.__init__ calls super().__init__(1): weight/bias are (1,1).
    weight = jnp.ones((1, 1), dtype=jnp.float32)
    bias = jnp.zeros((1, 1), dtype=jnp.float32)

    ref = _reference(x, weight, bias)

    # Default tiling (single chunk at this tiny shape).
    out = jax.block_until_ready(layer_normalizer(x, weight, bias))
    np.testing.assert_allclose(np.asarray(out), np.asarray(ref),
                               rtol=1e-5, atol=1e-5)

    # Force multiple reduction chunks to exercise the streaming accumulation path.
    out_stream = jax.block_until_ready(
        layer_normalizer(x, weight, bias, max_block_bytes=2 * 1024))
    np.testing.assert_allclose(np.asarray(out_stream), np.asarray(ref),
                               rtol=1e-5, atol=1e-5)

    print("KERNEL_OK")
</pallas_src>

<mosaic_0001>
module attributes {stable_mosaic.version = 11 : i64} {
  func.func @_stats_kernel(%arg0: i32, %arg1: i32, %arg2: memref<2x1024xf32, #tpu.memory_space<vmem>>, %arg3: memref<1x1xf32, #tpu.memory_space<smem>>, %arg4: memref<1x1xf32, #tpu.memory_space<smem>>, %arg5: memref<2x1xf32, #tpu.memory_space<vmem>>, %arg6: memref<2x1xf32, #tpu.memory_space<vmem>>, %arg7: memref<2x1024xf32, #tpu.memory_space<vmem>>, %arg8: memref<2x1024xf32, #tpu.memory_space<vmem>>) attributes {dimension_semantics = [#tpu.dimension_semantics<parallel>, #tpu.dimension_semantics<arbitrary>], iteration_bounds = array<i64: 1, 1>, scalar_prefetch = 0 : i64, scratch_operands = 2 : i64, tpu.core_type = #tpu.core_type<tc>, window_params = [{transform_indices = @transform_0, window_bounds = array<i64: 2, 1024>}, {transform_indices = @transform_1, window_bounds = array<i64: 1, 1>}, {transform_indices = @transform_2, window_bounds = array<i64: 1, 1>}, {transform_indices = @transform_3, window_bounds = array<i64: 2, 1>}, {transform_indices = @transform_4, window_bounds = array<i64: 2, 1>}]} {
    %c0_i32 = arith.constant 0 : i32
    %0 = arith.cmpi eq, %arg1, %c0_i32 : i32
    %1 = arith.extui %0 : i1 to i32
    %c0_i32_0 = arith.constant 0 : i32
    %2 = arith.cmpi ne, %1, %c0_i32_0 : i32
    scf.if %2 {
      %cst = arith.constant 0.000000e+00 : f32
      %14 = vector.broadcast %cst : f32 to vector<2x1024xf32>
      %c0_12 = arith.constant 0 : index
      %c0_13 = arith.constant 0 : index
      %15 = vector.load %arg7[%c0_12, %c0_13] : memref<2x1024xf32, #tpu.memory_space<vmem>>, vector<2x1024xf32>
      tpu.vector_store %arg7[%c0_12, %c0_13], %14 {strides = array<i32>} : memref<2x1024xf32, #tpu.memory_space<vmem>>, vector<2x1024xf32>,
      %cst_14 = arith.constant 0.000000e+00 : f32
      %16 = vector.broadcast %cst_14 : f32 to vector<2x1024xf32>
      %c0_15 = arith.constant 0 : index
      %c0_16 = arith.constant 0 : index
      %17 = vector.load %arg8[%c0_15, %c0_16] : memref<2x1024xf32, #tpu.memory_space<vmem>>, vector<2x1024xf32>
      tpu.vector_store %arg8[%c0_15, %c0_16], %16 {strides = array<i32>} : memref<2x1024xf32, #tpu.memory_space<vmem>>, vector<2x1024xf32>,
    } else {
    }
    %c0 = arith.constant 0 : index
    %c0_1 = arith.constant 0 : index
    %3 = vector.load %arg2[%c0, %c0_1] : memref<2x1024xf32, #tpu.memory_space<vmem>>, vector<2x1024xf32>
    %c0_2 = arith.constant 0 : index
    %c0_3 = arith.constant 0 : index
    %4 = vector.load %arg7[%c0_2, %c0_3] : memref<2x1024xf32, #tpu.memory_space<vmem>>, vector<2x1024xf32>
    %5 = arith.addf %4, %3 : vector<2x1024xf32>
    %c0_4 = arith.constant 0 : index
    %c0_5 = arith.constant 0 : index
    %6 = vector.load %arg7[%c0_4, %c0_5] : memref<2x1024xf32, #tpu.memory_space<vmem>>, vector<2x1024xf32>
    tpu.vector_store %arg7[%c0_4, %c0_5], %5 {strides = array<i32>} : memref<2x1024xf32, #tpu.memory_space<vmem>>, vector<2x1024xf32>,
    %c0_6 = arith.constant 0 : index
    %c0_7 = arith.constant 0 : index
    %7 = vector.load %arg8[%c0_6, %c0_7] : memref<2x1024xf32, #tpu.memory_space<vmem>>, vector<2x1024xf32>
    %8 = arith.mulf %3, %3 : vector<2x1024xf32>
    %9 = arith.addf %7, %8 : vector<2x1024xf32>
    %c0_8 = arith.constant 0 : index
    %c0_9 = arith.constant 0 : index
    %10 = vector.load %arg8[%c0_8, %c0_9] : memref<2x1024xf32, #tpu.memory_space<vmem>>, vector<2x1024xf32>
    tpu.vector_store %arg8[%c0_8, %c0_9], %9 {strides = array<i32>} : memref<2x1024xf32, #tpu.memory_space<vmem>>, vector<2x1024xf32>,
    %c0_i32_10 = arith.constant 0 : i32
    %11 = arith.cmpi eq, %arg1, %c0_i32_10 : i32
    %12 = arith.extui %11 : i1 to i32
    %c0_i32_11 = arith.constant 0 : i32
    %13 = arith.cmpi ne, %12, %c0_i32_11 : i32
    scf.if %13 {
      %c0_12 = arith.constant 0 : index
      %c0_13 = arith.constant 0 : index
      %14 = vector.load %arg7[%c0_12, %c0_13] : memref<2x1024xf32, #tpu.memory_space<vmem>>, vector<2x1024xf32>
      %cst = arith.constant dense<0.000000e+00> : vector<2xf32>
      %15 = vector.multi_reduction <add>, %14, %cst [1] : vector<2x1024xf32> to vector<2xf32>
      %16 = vector.shape_cast %15 : vector<2xf32> to vector<2x1xf32>
      %c0_14 = arith.constant 0 : index
      %c0_15 = arith.constant 0 : index
      %17 = vector.load %arg8[%c0_14, %c0_15] : memref<2x1024xf32, #tpu.memory_space<vmem>>, vector<2x1024xf32>
      %cst_16 = arith.constant dense<0.000000e+00> : vector<2xf32>
      %18 = vector.multi_reduction <add>, %17, %cst_16 [1] : vector<2x1024xf32> to vector<2xf32>
      %19 = vector.shape_cast %18 : vector<2xf32> to vector<2x1xf32>
      %cst_17 = arith.constant 9.765625E-4 : f32
      %20 = vector.broadcast %cst_17 : f32 to vector<2x1xf32>
      %21 = arith.mulf %16, %20 : vector<2x1xf32>
      %cst_18 = arith.constant 9.765625E-4 : f32
      %22 = vector.broadcast %cst_18 : f32 to vector<2x1xf32>
      %23 = arith.mulf %19, %22 : vector<2x1xf32>
      %24 = arith.mulf %21, %21 : vector<2x1xf32>
      %25 = arith.subf %23, %24 : vector<2x1xf32>
      %cst_19 = arith.constant 0.000000e+00 : f32
      %26 = vector.broadcast %cst_19 : f32 to vector<2x1xf32>
      %27 = arith.maximumf %25, %26 : vector<2x1xf32>
      %cst_20 = arith.constant 9.99999974E-6 : f32
      %28 = vector.broadcast %cst_20 : f32 to vector<2x1xf32>
      %29 = arith.addf %27, %28 : vector<2x1xf32>
      %30 = math.rsqrt %29 : vector<2x1xf32>
      %c0_21 = arith.constant 0 : index
      %c0_22 = arith.constant 0 : index
      %31 = memref.load %arg3[%c0_21, %c0_22] : memref<1x1xf32, #tpu.memory_space<smem>>
      %c0_23 = arith.constant 0 : index
      %c0_24 = arith.constant 0 : index
      %32 = memref.load %arg4[%c0_23, %c0_24] : memref<1x1xf32, #tpu.memory_space<smem>>
      %33 = vector.broadcast %31 : f32 to vector<2x1xf32>
      %34 = arith.mulf %33, %30 : vector<2x1xf32>
      %c0_25 = arith.constant 0 : index
      %c0_26 = arith.constant 0 : index
      %35 = vector.load %arg5[%c0_25, %c0_26] : memref<2x1xf32, #tpu.memory_space<vmem>>, vector<2x1xf32>
      tpu.vector_store %arg5[%c0_25, %c0_26], %34 {strides = array<i32>} : memref<2x1xf32, #tpu.memory_space<vmem>>, vector<2x1xf32>,
      %36 = arith.mulf %21, %34 : vector<2x1xf32>
      %37 = vector.broadcast %32 : f32 to vector<2x1xf32>
      %38 = arith.subf %37, %36 : vector<2x1xf32>
      %c0_27 = arith.constant 0 : index
      %c0_28 = arith.constant 0 : index
      %39 = vector.load %arg6[%c0_27, %c0_28] : memref<2x1xf32, #tpu.memory_space<vmem>>, vector<2x1xf32>
      tpu.vector_store %arg6[%c0_27, %c0_28], %38 {strides = array<i32>} : memref<2x1xf32, #tpu.memory_space<vmem>>, vector<2x1xf32>,
    } else {
    }
    return
  }
  func.func @transform_0(%arg0: i32, %arg1: i32) -> (i32, i32) {
    %c0_i32 = arith.constant 0 : i32
    return %arg0, %arg1 : i32, i32
  }
  func.func @transform_1(%arg0: i32, %arg1: i32) -> (i32, i32) {
    %c0_i32 = arith.constant 0 : i32
    %c0_i32_0 = arith.constant 0 : i32
    %c0_i32_1 = arith.constant 0 : i32
    return %c0_i32, %c0_i32_0 : i32, i32
  }
  func.func @transform_2(%arg0: i32, %arg1: i32) -> (i32, i32) {
    %c0_i32 = arith.constant 0 : i32
    %c0_i32_0 = arith.constant 0 : i32
    %c0_i32_1 = arith.constant 0 : i32
    return %c0_i32, %c0_i32_0 : i32, i32
  }
  func.func @transform_3(%arg0: i32, %arg1: i32) -> (i32, i32) {
    %c0_i32 = arith.constant 0 : i32
    %c0_i32_0 = arith.constant 0 : i32
    return %arg0, %c0_i32 : i32, i32
  }
  func.func @transform_4(%arg0: i32, %arg1: i32) -> (i32, i32) {
    %c0_i32 = arith.constant 0 : i32
    %c0_i32_0 = arith.constant 0 : i32
    return %arg0, %c0_i32 : i32, i32
  }
}

</mosaic_0001>

<bundles_post_ra>
// kernel: tpu_custom_call.1
= control target key start
LH: loop header
LB: loop body
LE: loop exit
PB: predicated region body
PF: predicated region fallthrough
CT: control target
= control target key end

     0   :  { %12 = vsyncpa [#allocation7], 0  ;;  %s240_s15 = smov [#allocation6]   ;;  %s307_s0 = inlined_call_operand.hbm [shape: f32[2,1024], index: 0, kind: input, shape index: {}]   ;;  %s308_s1 = inlined_call_operand.<no memory space> [shape: f32[1,1], index: 1, kind: input, shape index: {}]   ;;  %s309_s2 = inlined_call_operand.<no memory space> [shape: f32[1,1], index: 2, kind: input, shape index: {}]   ;;  %s310_s3 = inlined_call_operand.vmem [shape: f32[2,1], index: 3, kind: output, shape index: {0}]   ;;  %s311_s4 = inlined_call_operand.vmem [shape: f32[2,1], index: 4, kind: output, shape index: {1}]  }
   0x1   :  { %s19_s16 = sshll.u32 %s240_s15, 4  ;;  %s216_s19 = scalar_lea.hbm %s307_s0, 256  ;;  %s20_s16 = int_to_ptr.vmem [resolvable:$true] %s19_s16 }
   0x2   :  { %p217_p0 = scmp.ne.s32.totalorder %s307_s0, %s216_s19  ;;  %p220_p1 = scmp.lt.u32.totalorder %s216_s19, %s307_s0 }
   0x4   :  { %p222_p2 = pnand %p220_p1, %p217_p0 }
   0x6   :  { %225 = shalt.err (!%p222_p2)
}
   0x7   :  { %s226_s24 = scalar_lea.vmem %s20_s16, 256  ;;  %p231_p4 = scmp.lt.s32.totalorder %s20_s16, %s20_s16 }
   0x8   :  { %p227_p3 = scmp.ne.s32.totalorder %s20_s16, %s226_s24  ;;  %p232_p5 = scmp.lt.s32.totalorder %s226_s24, %s226_s24 }
   0xa   :  { %p233_p6 = por %p232_p5, %p231_p4 }
   0xc   :  { %p234_p7 = pnand %p233_p6, %p227_p3 }
   0xe   :  { %237 = shalt.err (!%p234_p7)
}
   0xf   :  { %22 = dma.hbm_to_vmem [thread:$0]  %s307_s0, 256, %s20_s16, [#allocation7]  }
  0x10   :  { %238 = dma.done.wait [#allocation7], 256  }
  0x11   :  { %239 = vsyncadd [#allocation7], 4294967040  ;;  %v65_v0 = vlaneseq  ;;  %v241_v1 = vmov 1983009808   ;;  %v38_v6 = vld [vmem:[#allocation6] sm:$0xff]  ;;  %v39_v7 = vld [vmem:[#allocation6 + $0x8] sm:$0xff] }
  0x12   :  { %v63_v2 = vunpack.c.l.s4 %v241_v1  ;;  %v61_v8 = vcombine.high %v38_v6, %v38_v6  ;;  %vm103_vm0 = vcmask 1041408   ;;  %v78_v10 = vcombine.high %v39_v7, %v39_v7 }
  0x13   :  { %v66_v3 = vshrl.u32 %v65_v0, 7  ;;  %v48_v11 = vmul.f32 %v38_v6, %v38_v6  ;;  %v49_v16 = vmul.f32 %v39_v7, %v39_v7  ;;  %vm195_vm1 = vcmask 1024  }
  0x14   :  { %v64_v4 = vunpack.c.0.s8 %v63_v2 }
  0x15   :  { %v125_v17 = vcombine.high %v48_v11, %v48_v11  ;;  %v142_v28 = vcombine.high %v49_v16, %v49_v16 }
  0x16   :  { %v67_v5 = vsub.s32 %v64_v4, %v66_v3  ;;  %v193_v4 = vstv %s308_s1 }
  0x18   :  { %v68_v9 = vrot.slane %v38_v6, %v67_v5  ;;  %v75_v12 = vrot.slane %v61_v8, %v67_v5  ;;  %v85_v14 = vrot.slane %v39_v7, %v67_v5  ;;  %v132_v18 = vrot.slane %v48_v11, %v67_v5 }
  0x19   :  { %v92_v22 = vrot.slane %v78_v10, %v67_v5  ;;  %v139_v24 = vrot.slane %v125_v17, %v67_v5  ;;  %v149_v31 = vrot.slane %v49_v16, %v67_v5  ;;  %v156_v40 = vrot.slane %v142_v28, %v67_v5 }
  0x1a   :  { %v76_v13 = vcombine.high %v68_v9, %v68_v9  ;;  %v104_v15 = vsel %vm103_vm0, %v68_v9, 0.0  ;;  %v77_v19 = vcombine.high %v75_v12, %v75_v12  ;;  %v107_v21 = vsel %vm103_vm0, %v75_v12, 0.0 }
  0x1b   :  { %v93_v25 = vcombine.high %v85_v14, %v85_v14  ;;  %v140_v27 = vcombine.high %v132_v18, %v132_v18  ;;  %v141_v30 = vcombine.high %v139_v24, %v139_v24  ;;  %v167_v32 = vsel %vm103_vm0, %v132_v18, 0.0 }
  0x1c   :  { %v105_v20 = vsel %vm103_vm0, %v76_v13, 0.0  ;;  %v109_v26 = vsel %vm103_vm0, %v77_v19, 0.0  ;;  %v111_v33 = vsel %vm103_vm0, %v85_v14, 0.0  ;;  %v170_v35 = vsel %vm103_vm0, %v139_v24, 0.0 }
  0x1d   :  { %v106_v23 = vadd.f32 %v105_v20, %v104_v15  ;;  %v168_v34 = vsel %vm103_vm0, %v140_v27, 0.0  ;;  %v94_v36 = vcombine.high %v92_v22, %v92_v22  ;;  %v113_v39 = vsel %vm103_vm0, %v93_v25, 0.0 }
  0x1e   :  { %v169_v38 = vadd.f32 %v168_v34, %v167_v32  ;;  %v157_v41 = vcombine.high %v149_v31, %v149_v31  ;;  %v172_v42 = vsel %vm103_vm0, %v141_v30, 0.0  ;;  %v115_v45 = vsel %vm103_vm0, %v92_v22, 0.0 }
  0x1f   :  { %v108_v29 = vadd.f32 %v107_v21, %v106_v23  ;;  %v174_v46 = vsel %vm103_vm0, %v149_v31, 0.0  ;;  %v117_v49 = vsel %vm103_vm0, %v94_v36, 0.0  ;;  %v158_v50 = vcombine.high %v156_v40, %v156_v40 }
  0x20   :  { %v171_v44 = vadd.f32 %v170_v35, %v169_v38  ;;  %v176_v51 = vsel %vm103_vm0, %v157_v41, 0.0  ;;  %v178_v54 = vsel %vm103_vm0, %v156_v40, 0.0  ;;  %v198_v7 = vstv %s309_s2 }
  0x21   :  { %v110_v37 = vadd.f32 %v109_v26, %v108_v29  ;;  %v180_v57 = vsel %vm103_vm0, %v158_v50, 0.0 }
  0x22   :  { %v173_v48 = vadd.f32 %v172_v42, %v171_v44 }
  0x23   :  { %v112_v43 = vadd.f32 %v111_v33, %v110_v37 }
  0x24   :  { %v175_v53 = vadd.f32 %v174_v46, %v173_v48 }
  0x25   :  { %v114_v47 = vadd.f32 %v113_v39, %v112_v43 }
  0x26   :  { %v177_v56 = vadd.f32 %v176_v51, %v175_v53 }
  0x27   :  { %v116_v52 = vadd.f32 %v115_v45, %v114_v47 }
  0x28   :  { %v179_v58 = vadd.f32 %v178_v54, %v177_v56 }
  0x29   :  { %v118_v55 = vadd.f32 %v117_v49, %v116_v52 }
  0x2a   :  { %v181_v59 = vadd.f32 %v180_v57, %v179_v58 }
  0x2b   :  { %119 = vadd.xlane.f32.xlu0 %v118_v55 }
  0x2f   :  { %182 = vadd.xlane.f32.xlu0 %v181_v59 }
  0xb8   :  { %v120_v60 = vpop.xlane.xlu0 %119 }
  0xb9   :  { %v184_v61 = vmul.f32 0.0009765625, %v120_v60 }
  0xbb   :  { %v186_v63 = vmul.f32 %v184_v61, %v184_v61 }
  0xbc   :  { %v183_v62 = vpop.xlane.xlu0 %182 }
  0xbd   :  { %v185_v0 = vmul.f32 0.0009765625, %v183_v62 }
  0xbf   :  { %v187_v1 = vsub.f32 %v185_v0, %v186_v63 }
  0xc1   :  { %v188_v2 = vmax.f32 %v187_v1, 0.0 }
  0xc3   :  { %v189_v3 = vadd.f32 1e-05, %v188_v2 }
  0xc5   :  { %214 = vrsqrt.f32 %v189_v3 }
  0xcf   :  { %v215_v5 = vpop.eup %214 }
  0xd0   :  { %v194_v6 = vmul.f32 %v215_v5, %v193_v4 }
  0xd2   :  { %196 = vst.msk [vmem:[%s310_s3] sm:$0x3] %vm195_vm1, %v194_v6  ;;  %v197_v8 = vmul.f32 %v194_v6, %v184_v61 }
  0xd4   :  { %v199_v9 = vsub.f32 %v198_v7, %v197_v8 }
  0xd6   :  { %200 = vst.msk [vmem:[%s311_s4] sm:$0x3] %vm195_vm1, %v199_v9 }
  0xd7   :  { %209 = vsyncpa [#allocation7], 1 }

</bundles_post_ra>
